<compile_context>
chip_gen: v6e
topology: v6e:2x2x1
jax: 0.10.0
libtpu: 0.0.40
codegen_flags: <defaults>
</compile_context>

<pallas_src>
import jax
import jax.numpy as jnp
from jax.experimental import pallas as pl
from jax.experimental.pallas import tpu as pltpu


def discriminator_kernel(s_ref, h_ref, wt_ref, b_ref, out_ref, t_ref):
    # s_ref:  (1, 1, H)       VMEM  summary vector of current batch b
    # h_ref:  (1, TILE_N, H)  VMEM  node-embedding tile (input dtype, no upcast)
    # wt_ref: (H, H)          VMEM  W^T, resident (constant index_map)
    # b_ref:  (1, 1)          SMEM  scalar bias
    # out_ref:(1, 1, TILE_N)  VMEM  lane-dense output row
    # t_ref:  (1, H) f32      VMEM scratch  t[b] = s[b] @ W^T

    # Hoist t = s @ W^T: only on the first node tile of each batch element
    # (node-tile axis is the inner "arbitrary" grid axis).
    @pl.when(pl.program_id(1) == 0)
    def _():
        t_ref[...] = jnp.dot(
            s_ref[0], wt_ref[...], preferred_element_type=jnp.float32
        )  # (1, H)

    h_tile = h_ref[0]                           # (TILE_N, H), native dtype
    t_row = t_ref[...].astype(h_tile.dtype)     # (1, H), MXU-native dtype

    # out[n] = sum_i t[i] * h[n, i]  -> MXU matmul contracting over H
    # (rhs-transposed contraction; result already lane-dense (1, TILE_N)).
    scores = jax.lax.dot_general(
        t_row, h_tile,
        dimension_numbers=(((1,), (1,)), ((), ())),
        preferred_element_type=jnp.float32,
    )                                           # (1, TILE_N) f32

    out_ref[0] = (scores + b_ref[0, 0]).astype(out_ref.dtype)


def discriminator_forward(s, h, w, bias, *, tile_n=512):
    """s: (B, H), h: (B, N, H), w: (H, H), bias: (1, 1) -> (B, N)."""
    B, N, H = h.shape
    assert s.shape == (B, H) and w.shape == (H, H) and bias.shape == (1, 1)

    # Tile the node axis. Single tile if N is small; otherwise keep TILE_N a
    # multiple of 128 so the output block is lane-dense (and a multiple of 8
    # for the sublane axis of the h block).
    if N <= tile_n:
        tile_n = N
    else:
        tile_n = max(128, (tile_n // 128) * 128)

    grid = (B, pl.cdiv(N, tile_n))

    s3 = s.reshape(B, 1, H)      # leading size-1 dim keeps last-two-dim tiling legal
    wt = w.T                     # t[b, i] = sum_j W[i, j] * s[b, j] = (s @ W^T)[b, i]

    itemsize = h.dtype.itemsize
    flops = 2 * B * N * H + 2 * B * H * H
    bytes_accessed = (
        B * N * H * itemsize          # h (dominant)
        + B * H * s.dtype.itemsize    # s
        + H * H * w.dtype.itemsize    # W
        + B * N * s.dtype.itemsize    # out
    )

    out3 = pl.pallas_call(
        discriminator_kernel,
        out_shape=jax.ShapeDtypeStruct((B, 1, N), s.dtype),
        grid=grid,
        in_specs=[
            pl.BlockSpec((1, 1, H), lambda b, n: (b, 0, 0)),        # s  (per-batch)
            pl.BlockSpec((1, tile_n, H), lambda b, n: (b, n, 0)),   # h  (streamed)
            pl.BlockSpec((H, H), lambda b, n: (0, 0)),              # W^T (resident)
            pl.BlockSpec((1, 1), lambda b, n: (0, 0),
                         memory_space=pltpu.MemorySpace.SMEM),      # bias scalar
        ],
        out_specs=pl.BlockSpec((1, 1, tile_n), lambda b, n: (b, 0, n)),
        scratch_shapes=[pltpu.VMEM((1, H), jnp.float32)],           # t = s @ W^T
        compiler_params=pltpu.CompilerParams(
            dimension_semantics=("parallel", "arbitrary"),
            vmem_limit_bytes=32 * 1024 * 1024,
        ),
        cost_estimate=pl.CostEstimate(
            flops=flops, transcendentals=0, bytes_accessed=bytes_accessed
        ),
    )(s3, h, wt, bias)

    return out3.reshape(B, N)


def init_bilinear_params(key, n_h, dtype=jnp.float32):
    """xavier_uniform for nn.Bilinear(n_h, n_h, 1) weight (out_features == 1); bias = 0."""
    fan_in = n_h * n_h
    fan_out = 1 * n_h
    bound = (6.0 / (fan_in + fan_out)) ** 0.5
    w = jax.random.uniform(key, (n_h, n_h), dtype=dtype, minval=-bound, maxval=bound)
    bias = jnp.zeros((1, 1), dtype=dtype)
    return w, bias


if __name__ == "__main__":
    key = jax.random.PRNGKey(0)
    k_s, k_h, k_w, k_s2, k_h2 = jax.random.split(key, 5)

    # Small shapes consistent with the module: batch=2, nodes=8, hidden=32.
    B, N, H = 2, 8, 32
    s = jax.random.normal(k_s, (B, H), dtype=jnp.float32)
    h = jax.random.normal(k_h, (B, N, H), dtype=jnp.float32)
    w, bias = init_bilinear_params(k_w, H)

    out = discriminator_forward(s, h, w, bias)
    out = jax.block_until_ready(out)
    ref = jnp.einsum("bni,ij,bj->bn", h, w, s) + bias[0, 0]
    assert out.shape == (B, N)
    assert jnp.allclose(out, ref, atol=1e-4, rtol=1e-4)

    # Exercise the multi-tile path (grid over node tiles + per-batch t hoist).
    N2 = 384
    s2 = jax.random.normal(k_s2, (B, H), dtype=jnp.float32)
    h2 = jax.random.normal(k_h2, (B, N2, H), dtype=jnp.float32)
    out2 = discriminator_forward(s2, h2, w, bias, tile_n=128)
    out2 = jax.block_until_ready(out2)
    ref2 = jnp.einsum("bni,ij,bj->bn", h2, w, s2) + bias[0, 0]
    assert out2.shape == (B, N2)
    assert jnp.allclose(out2, ref2, atol=1e-4, rtol=1e-4)

    print("KERNEL_OK")
</pallas_src>

<mosaic_0001>
module attributes {stable_mosaic.version = 11 : i64} {
  func.func @discriminator_kernel(%arg0: i32, %arg1: i32, %arg2: memref<1x1x32xf32, #tpu.memory_space<vmem>>, %arg3: memref<1x8x32xf32, #tpu.memory_space<vmem>>, %arg4: memref<32x32xf32, #tpu.memory_space<vmem>>, %arg5: memref<1x1xf32, #tpu.memory_space<smem>>, %arg6: memref<1x1x8xf32, #tpu.memory_space<vmem>>, %arg7: memref<1x32xf32, #tpu.memory_space<vmem>>) attributes {dimension_semantics = [#tpu.dimension_semantics<parallel>, #tpu.dimension_semantics<arbitrary>], iteration_bounds = array<i64: 2, 1>, scalar_prefetch = 0 : i64, scratch_operands = 1 : i64, tpu.core_type = #tpu.core_type<tc>, window_params = [{transform_indices = @transform_0, window_bounds = array<i64: 1, 1, 32>}, {transform_indices = @transform_1, window_bounds = array<i64: 1, 8, 32>}, {pipeline_mode = #tpu.pipeline_mode<synchronous>, transform_indices = @transform_2, window_bounds = array<i64: 32, 32>}, {transform_indices = @transform_3, window_bounds = array<i64: 1, 1>}, {transform_indices = @transform_4, window_bounds = array<i64: 1, 1, 8>}]} {
    %c0_i32 = arith.constant 0 : i32
    %0 = arith.cmpi eq, %arg1, %c0_i32 : i32
    %1 = arith.extui %0 : i1 to i32
    %c0_i32_0 = arith.constant 0 : i32
    %2 = arith.cmpi ne, %1, %c0_i32_0 : i32
    scf.if %2 {
      %c0_10 = arith.constant 0 : index
      %c0_11 = arith.constant 0 : index
      %c0_12 = arith.constant 0 : index
      %13 = vector.load %arg2[%c0_10, %c0_11, %c0_12] : memref<1x1x32xf32, #tpu.memory_space<vmem>>, vector<1x1x32xf32>
      %14 = vector.shape_cast %13 : vector<1x1x32xf32> to vector<1x32xf32>
      %c0_13 = arith.constant 0 : index
      %c0_14 = arith.constant 0 : index
      %15 = vector.load %arg4[%c0_13, %c0_14] : memref<32x32xf32, #tpu.memory_space<vmem>>, vector<32x32xf32>
      %cst_15 = arith.constant dense<0.000000e+00> : vector<1x32xf32>
      %16 = tpu.matmul %14, %15, %cst_15 {dimension_numbers = #tpu.dot_dimension_numbers<[1], [0], [0], [1], [0, 0, 1, 1], [], []>} : vector<1x32xf32>, vector<32x32xf32>, vector<1x32xf32> -> vector<1x32xf32>
      %c0_16 = arith.constant 0 : index
      %c0_17 = arith.constant 0 : index
      %17 = vector.load %arg7[%c0_16, %c0_17] : memref<1x32xf32, #tpu.memory_space<vmem>>, vector<1x32xf32>
      tpu.vector_store %arg7[%c0_16, %c0_17], %16 {strides = array<i32>} : memref<1x32xf32, #tpu.memory_space<vmem>>, vector<1x32xf32>,
    } else {
    }
    %c0 = arith.constant 0 : index
    %c0_1 = arith.constant 0 : index
    %c0_2 = arith.constant 0 : index
    %3 = vector.load %arg3[%c0, %c0_1, %c0_2] : memref<1x8x32xf32, #tpu.memory_space<vmem>>, vector<1x8x32xf32>
    %4 = vector.shape_cast %3 : vector<1x8x32xf32> to vector<8x32xf32>
    %c0_3 = arith.constant 0 : index
    %c0_4 = arith.constant 0 : index
    %5 = vector.load %arg7[%c0_3, %c0_4] : memref<1x32xf32, #tpu.memory_space<vmem>>, vector<1x32xf32>
    %cst = arith.constant dense<0.000000e+00> : vector<1x8xf32>
    %6 = tpu.matmul %5, %4, %cst {dimension_numbers = #tpu.dot_dimension_numbers<[1], [1], [0], [0], [0, 0, 1, 0], [], []>} : vector<1x32xf32>, vector<8x32xf32>, vector<1x8xf32> -> vector<1x8xf32>
    %c0_5 = arith.constant 0 : index
    %c0_6 = arith.constant 0 : index
    %7 = memref.load %arg5[%c0_5, %c0_6] : memref<1x1xf32, #tpu.memory_space<smem>>
    %8 = vector.broadcast %7 : f32 to vector<1x8xf32>
    %9 = arith.addf %6, %8 : vector<1x8xf32>
    %c0_7 = arith.constant 0 : index
    %c0_8 = arith.constant 0 : index
    %c0_9 = arith.constant 0 : index
    %10 = vector.load %arg6[%c0_7, %c0_8, %c0_9] : memref<1x1x8xf32, #tpu.memory_space<vmem>>, vector<1x1x8xf32>
    %11 = vector.shape_cast %10 : vector<1x1x8xf32> to vector<1x8xf32>
    %12 = vector.shape_cast %9 : vector<1x8xf32> to vector<1x1x8xf32>
    tpu.vector_store %arg6[%c0_7, %c0_8, %c0_9], %12 {strides = array<i32>} : memref<1x1x8xf32, #tpu.memory_space<vmem>>, vector<1x1x8xf32>,
    return
  }
  func.func @transform_0(%arg0: i32, %arg1: i32) -> (i32, i32, i32) {
    %c0_i32 = arith.constant 0 : i32
    %c0_i32_0 = arith.constant 0 : i32
    %c0_i32_1 = arith.constant 0 : i32
    return %arg0, %c0_i32, %c0_i32_0 : i32, i32, i32
  }
  func.func @transform_1(%arg0: i32, %arg1: i32) -> (i32, i32, i32) {
    %c0_i32 = arith.constant 0 : i32
    %c0_i32_0 = arith.constant 0 : i32
    return %arg0, %arg1, %c0_i32 : i32, i32, i32
  }
  func.func @transform_2(%arg0: i32, %arg1: i32) -> (i32, i32) {
    %c0_i32 = arith.constant 0 : i32
    %c0_i32_0 = arith.constant 0 : i32
    %c0_i32_1 = arith.constant 0 : i32
    return %c0_i32, %c0_i32_0 : i32, i32
  }
  func.func @transform_3(%arg0: i32, %arg1: i32) -> (i32, i32) {
    %c0_i32 = arith.constant 0 : i32
    %c0_i32_0 = arith.constant 0 : i32
    %c0_i32_1 = arith.constant 0 : i32
    return %c0_i32, %c0_i32_0 : i32, i32
  }
  func.func @transform_4(%arg0: i32, %arg1: i32) -> (i32, i32, i32) {
    %c0_i32 = arith.constant 0 : i32
    %c0_i32_0 = arith.constant 0 : i32
    return %arg0, %c0_i32, %arg1 : i32, i32, i32
  }
}

</mosaic_0001>

<bundles_post_ra>
// kernel: tpu_custom_call.1
= control target key start
LH: loop header
LB: loop body
LE: loop exit
PB: predicated region body
PF: predicated region fallthrough
CT: control target
= control target key end

     0   :  { %s1006_s0 = inlined_call_operand.vmem [shape: f32[2,1,32], index: 0, kind: input, shape index: {}]   ;;  %s1007_s1 = inlined_call_operand.hbm [shape: f32[2,8,32], index: 1, kind: input, shape index: {}]   ;;  %s1008_s2 = inlined_call_operand.hbm [shape: f32[32,32], index: 2, kind: input, shape index: {}]   ;;  %s1009_s3 = inlined_call_operand.<no memory space> [shape: f32[1,1], index: 3, kind: input, shape index: {}]   ;;  %s1010_s4 = inlined_call_operand.hbm [shape: f32[2,1,8], index: 4, kind: output, shape index: {}]  }
   0x1   :  { %9 = sst [smem:[#allocation3]] %s1009_s3 }
   0x2   :  { %10 = vsyncpa [#allocation5], 0 }
   0x3   :  { %12 = vsyncpa [#allocation5 + $0x1], 0 }
   0x4   :  { %13 = vsyncpa [#allocation8], 0 }
   0x5   :  { %14 = vsyncpa [#allocation6], 0 }
   0x6   :  { %16 = vsyncpa [#allocation6 + $0x1], 0  ;;  %s827_s17 = smov 0   ;;  %s829_s18 = smov 0  }
   0x7   :  { %s831_s19 = smov 0   ;;  %s833_s20 = smov 0  }
   0x8   :  { %s835_s21 = smov 0   ;;  %s837_s22 = smov 0  }
   0x9 LB: > { %s536_s3 = sadd.s32 4294967295, %s790_s22   ;;  %s537_s23 = sadd.s32 4294967294, %s790_s22   ;;  %s790_s22 = sphi %s837_s22, %s22_s22   ;;  %s786_s21 = sphi %s835_s21, %s1028_s21   ;;  %s782_s20 = sphi %s833_s20, %s1027_s20   ;;  %s778_s19 = sphi %s831_s19, %s1026_s19   ;;  %s774_s18 = sphi %s829_s18, %s1025_s18   ;;  %s770_s17 = sphi %s827_s17, %s1024_s17  }
   0xa   : > { %p82_p0 = scmp.ne.s32.totalorder %s774_s18, %s770_s17  ;;  %p861_p1 = scmp.eq.s32.totalorder %s536_s3, 0 }
   0xb   : > { %p865_p2 = scmp.eq.s32.totalorder %s536_s3, 1  ;;  %p156_p3 = scmp.eq.s32.totalorder %s537_s23, 1 }
   0xc   : > { %p871_p4 = por %p861_p1, %p82_p0  ;;  %p538_p5 = scmp.ge.s32.totalorder %s790_s22, 1 }
   0xd   : > { %p876_p6 = por %p156_p3, %p82_p0  ;;  %p163_p7 = scmp.lt.s32.totalorder %s790_s22, 3 }
   0xe   : > { %s1014_s26 = scalar_select %p871_p4, 1, 0 }
   0xf   : > { %s1015_s27 = scalar_select %p876_p6, 1, 0 }
  0x10   : > { %p881_p8 = pnand %p538_p5, %p163_p7  ;;  %s792_s29 = smov [#allocation7]  }
  0x11   : > { %s175_s30 = sshll.u32 %s792_s29, 4  ;;  %s34_s6 = sadd.s32 1, %s786_s21  ;;  %s176_s30 = int_to_ptr.vmem [resolvable:$true] %s175_s30 }
  0x12   : > { %p583_p9 = pneg %p881_p8  ;;  %s663_s7 = scalar_lea.vmem %s176_s30, 512 }
  0x13   : > { %p664_p13 = scmp.ne.s32.totalorder %s176_s30, %s663_s7  ;;  %p671_p5 = scmp.lt.s32.totalorder %s176_s30, %s176_s30 }
  0x14   : > { %p890_p11 = pnand %p583_p9, %p861_p1  ;;  %p672_p7 = scmp.lt.s32.totalorder %s663_s7, %s663_s7 }
  0x16   : > { %p654_p12 = pneg %p890_p11  ;;  %p673_p6 = por %p672_p7, %p671_p5 }
  0x18   : > { %p666_p0 = pnand %p664_p13, %p654_p12 }
  0x1a   : > { %p667_p3 = pneg %p666_p0 }
  0x1c   : > { %p674_p4 = pnand %p673_p6, %p667_p3 }
  0x1e   : > { %677 = shalt.err (!%p674_p4)
}
  0x1f   : > { %s793_s8 = smov 128   ;;  %s794_s9 = smov 8  }
  0x20   : > { %586 = dma.hbm_to_vmem [thread:$0]  (!%p890_p11), %s1008_s2, 512, %s176_s30, [#allocation8], %s793_s8, %s793_s8, %s794_s9  }
  0x21   : > { %p36_p6 = scmp.ge.s32.totalorder %s34_s6, 2  ;;  %s69_s12 = sadd.s32 1, %s778_s19 }
  0x22   : > { %p76_p4 = scmp.ne.s32.totalorder %s778_s19, %s774_s18  ;;  %p77_p9 = scmp.eq.s32.totalorder %s790_s22, 0 }
  0x23   : > { %s1030_s6 = smov (%p36_p6, %s34_s6), 0  ;;  %p596_p0 = scmp.lt.s32.totalorder %s790_s22, 2 }
  0x24   : > { %p908_p12 = por %p77_p9, %p76_p4  ;;  %p914_p13 = por %p865_p2, %p76_p4 }
  0x25   : > { %s64_s15 = ssub.s32 %s786_s21, %s1030_s6  ;;  %s198_s16 = sand.u32 1, %s778_s19  }
  0x26   : > { %p67_p11 = scmp.eq.s32.totalorder %s64_s15, 0  ;;  %s541_s3 = sshll.u32 %s198_s16, 3 }
  0x27   : > { %s542_s29 = sshll.u32 %s786_s21, 7  ;;  %s202_s8 = scalar_lea.vmem [#allocation4], %s541_s3 }
  0x28   : > { %s923_s23 = scalar_select %p67_p11, %s778_s19, %s69_s12  }
  0x29   : > { %s208_s7 = scalar_lea.hbm %s1007_s1, %s542_s29  ;;  %s210_s9 = sshll.u32 %s202_s8, 4  ;;  %s211_s9 = int_to_ptr.vmem [resolvable:$true] %s210_s9 }
  0x2a   : > { %p931_p2 = pnand %p596_p0, %p908_p12  ;;  %s199_s10 = scalar_lea.sflag [#allocation5], %s198_s16 }
  0x2b   : > { %s691_s11 = scalar_lea.vmem %s211_s9, 128  ;;  %s795_s12 = smov [#allocation4]  }
  0x2c   : > { %p680_p3 = pneg %p931_p2  ;;  %p692_p5 = scmp.ne.s32.totalorder %s211_s9, %s691_s11 }
  0x2d   : > { %s696_s15 = sshll.u32 %s795_s12, 4  ;;  %s697_s15 = int_to_ptr.vmem [resolvable:$false] %s696_s15 }
  0x2e   : > { %p694_p7 = pnand %p692_p5, %p680_p3  ;;  %s698_s29 = scalar_lea.vmem %s697_s15, 256 }
  0x2f   : > { %p699_p4 = scmp.lt.s32.totalorder %s211_s9, %s697_s15  ;;  %p700_p9 = scmp.lt.s32.totalorder %s698_s29, %s691_s11 }
  0x30   : > { %p695_p6 = pneg %p694_p7 }
  0x31   : > { %p701_p11 = por %p700_p9, %p699_p4 }
  0x33   : > { %p702_p10 = pnand %p701_p11, %p695_p6 }
  0x35   : > { %705 = shalt.err (!%p702_p10)
}
  0x36   : > { %590 = dma.hbm_to_vmem [thread:$0]  (!%p931_p2), %s208_s7, 128, %s211_s9, %s199_s10  }
  0x37   : > { %219 = sbr.rel (%p881_p8) target bundleno = 482 (0x1e2), region = 36  ;;  %s942_s13 = sand.u32 (!%p881_p8), 1, %s774_s18  }
  0x38   : > { %s544_s16 = sshll.u32 (!%p881_p8), %s942_s13, 3  ;;  %s222_s3 = scalar_lea.sflag (!%p881_p8), [#allocation5], %s942_s13 }
  0x39   : > { %s225_s30 = scalar_lea.vmem (!%p881_p8), [#allocation4], %s544_s16  ;;  %p1021_p12 = scmp.ne.s32.totalorder (!%p881_p8), %s1014_s26, 0 }
  0x3c   : > { %757 = dma.done.wait (%p1021_p12), %s222_s3, 128  }
  0x3d   : > { %759 = vsyncadd (%p1021_p12), %s222_s3, 4294967168 }
  0x3e   : > { %761 = dma.done.wait (%p861_p1), [#allocation8], 512  }
  0x3f   : > { %763 = vsyncadd (%p861_p1), [#allocation8], 4294966784  ;;  %v796_v0 = vmov 0.0   ;;  %vm797_vm0 = vmmov 0   ;;  %p256_p8 = scmp.lt.s32.totalorder %s782_s20, 1  ;;  %v267_v1 = vld [vmem:[#allocation7 + $0x18] sm:$0xff] }
  0x40   : > { %559 = vmatprep.subr.mxu0 %v796_v0  ;;  %567 = vmatprep.mubr.msk.f32.mxu0 %vm797_vm0, %v796_v0  ;;  %v266_v2 = vld [vmem:[#allocation7 + $0x10] sm:$0xff]  ;;  %v265_v3 = vld [vmem:[#allocation7 + $0x8] sm:$0xff]  ;;  %v264_v4 = vld [vmem:[#allocation7] sm:$0xff]  ;;  %vm268_vm1 = vcmask 261120   ;;  %vm342_vm2 = vcmask 253952   ;;  %s346_s7 = sld [smem:[#allocation3]] }
  0x41   : > { %570 = vmatprep.subr.mxu1 %v796_v0  ;;  %572 = vmatprep.mubr.msk.f32.mxu1 %vm797_vm0, %v796_v0  ;;  %s257_s28 = scalar_select %p256_p8, %s782_s20, 1  ;;  %v344_v6 = vld [vmem:[%s225_s30] sm:$0xff]  ;;  %vm425_vm3 = vcmask 57344  }
  0x42   : > { %560 = vmatpush3.msra.mxu0 %v267_v1  ;;  %571 = vmatpush3.xpose.msk.msra.mxu1 %vm268_vm1, %v344_v6  ;;  %s549_s8 = sshll.u32 %s782_s20, 4  ;;  %s255_s9 = scalar_lea.vmem [#allocation9], %s942_s13 }
  0x43   : > { %561 = vmatprep.subr.mxu0 %v796_v0  ;;  %s258_s24 = scalar_lea.vmem %s1006_s0, %s257_s28  ;;  %s441_s25 = sshll.u32 %s255_s9, 4  ;;  %s442_s25 = int_to_ptr.vmem [resolvable:$true] %s441_s25 }
  0x44   : > { %562 = vmatpush3.msra.mxu0 %v266_v2  ;;  %v263_v5 = vld [vmem:[%s258_s24] sm:$0x1]  ;;  %s964_s12 = scalar_lea.hbm %s1010_s4, %s549_s8  ;;  %s428_s15 = scalar_lea.sflag [#allocation6], %s942_s13 }
  0x45   : > { %563 = vmatprep.subr.mxu0 %v796_v0  ;;  %s706_s29 = scalar_lea.vmem %s442_s25, 16  ;;  %s798_s20 = smov [#allocation9]  }
  0x46   : > { %564 = vmatpush3.msra.mxu0 %v265_v3  ;;  %v347_v10 = vstv %s346_s7  ;;  %p707_p1 = scmp.ne.s32.totalorder %s442_s25, %s706_s29  ;;  %s710_s16 = sshll.u32 %s798_s20, 4  ;;  %s711_s16 = int_to_ptr.vmem [resolvable:$false] %s710_s16 }
  0x47   : > { %565 = vmatprep.subr.mxu0 %v796_v0  ;;  %s712_s3 = scalar_lea.vmem %s711_s16, 32  ;;  %p713_p2 = scmp.lt.s32.totalorder %s442_s25, %s711_s16 }
  0x48   : > { %566 = vmatpush3.msra.mxu0 %v264_v4  ;;  %p708_p10 = pnand %p707_p1, %p914_p13  ;;  %p714_p3 = scmp.lt.s32.totalorder %s712_s3, %s706_s29 }
  0x49   : > { %568 = vmatmul.mubr.msk.f32.vlgmr.msra.gmra.mxu0 %vm268_vm1, %v263_v5 }
  0x4a   : > { %p709_p0 = pneg %p708_p10  ;;  %p715_p5 = por %p714_p3, %p713_p2 }
  0x4c   : > { %p716_p7 = pnand %p715_p5, %p709_p0 }
 0x109   : > { %v338_v7 = vpop.f32.mrf.mxu0 }
 0x10a   : > { %343 = vst.msk [vmem:[#allocation2] sm:$0x1] %vm342_vm2, %v338_v7 }
 0x10b   : > { %v569_v8 = vpop.f32.mrf.mxu0 }
 0x111   : > { %v345_v9 = vld [vmem:[#allocation2] sm:$0x1] }
 0x112   : > { %573 = vmatmul.mubr.msk.f32.vlgmr.msra.gmra.mxu1 %vm268_vm1, %v345_v9 }
 0x1d2   : > { %v421_v11 = vpop.f32.mrf.mxu1 }
 0x1d3   : > { %v422_v12 = vadd.f32 %v421_v11, %v347_v10 }
 0x1d4   : > { %v574_v13 = vpop.f32.mrf.mxu1 }
 0x1d5   : > { %426 = vst.msk [vmem:[%s255_s9] sm:$0x1] %vm425_vm3, %v422_v12 }
 0x1d6   : > { %719 = shalt.err (!%p716_p7)
}
 0x1d7   : > { %s720_s30 = scalar_lea.hbm %s964_s12, 16  ;;  %s724_s26 = scalar_lea.hbm %s1010_s4, 32 }
 0x1d8   : > { %p721_p6 = scmp.ne.s32.totalorder %s964_s12, %s720_s30  ;;  %p725_p11 = scmp.lt.s32.totalorder %s964_s12, %s1010_s4 }
 0x1d9   : > { %p726_p12 = scmp.lt.s32.totalorder %s724_s26, %s720_s30 }
 0x1da   : > { %p722_p4 = pnand %p721_p6, %p914_p13 }
 0x1db   : > { %p727_p8 = por %p726_p12, %p725_p11 }
 0x1dc   : > { %p723_p9 = pneg %p722_p4 }
 0x1de   : > { %p728_p1 = pnand %p727_p8, %p723_p9 }
 0x1e0   : > { %731 = shalt.err (!%p728_p1)
}
 0x1e1   : > { %581 = dma.vmem_to_hbm [thread:$0]  (%p914_p13), %s442_s25, 16, %s964_s12, %s428_s15  }
 0x1e2 PF: > { %s453_s7 = sand.u32 1, %s770_s17   ;;  %p1022_p10 = scmp.ne.s32.totalorder %s1015_s27, 0 }
 0x1e3   : > { %p1023_p0 = scmp.ge.s32.totalorder %s790_s22, 2  ;;  %s454_s8 = scalar_lea.sflag [#allocation6], %s453_s7 }
 0x1e5   : > { %p592_p2 = pnand %p1023_p0, %p1022_p10 }
 0x1e7   : > { %p593_p3 = pneg %p592_p2 }
 0x1e9   : > { %765 = dma.done.wait (%p593_p3), %s454_s8, 16  }
 0x1ea   : > { %767 = vsyncadd (%p593_p3), %s454_s8, 4294967280  ;;  %s22_s22 = sadd.s32 1, %s790_s22   ;;  %s1024_s17 = smov %s774_s18 }
 0x1eb   : > { %p19_p5 = scmp.ge.s32.totalorder %s22_s22, 4   ;;  %s1025_s18 = smov %s778_s19 }
 0x1ec   : > { %s1026_s19 = smov %s923_s23  ;;  %s1027_s20 = smov %s786_s21 }
 0x1ed   : > { %s1028_s21 = smov %s1030_s6  ;;  %21 = sbr.rel (!%p19_p5) target bundleno = 9 (0x9), region = 92 }
 0x1f2   :  { %458 = vsyncpa [#allocation5], 1 }
 0x1f3   :  { %460 = vsyncpa [#allocation5 + $0x1], 1 }
 0x1f4   :  { %461 = vsyncpa [#allocation8], 1 }
 0x1f5   :  { %462 = vsyncpa [#allocation6], 1 }
 0x1f6   :  { %464 = vsyncpa [#allocation6 + $0x1], 1 }

</bundles_post_ra>
